<compile_context>
chip_gen: v5e
topology: v5e:2x2
jax: 0.10.0
libtpu: 0.0.40
codegen_flags: <defaults>
</compile_context>

<pallas_src>
import jax
import jax.numpy as jnp
import numpy as np
from jax.experimental import pallas as pl
from jax.experimental.pallas import tpu as pltpu

C_LIST = [8, 16, 24, 32, 48]          # channels of t1..t5 (c_plist[:-1])
C_SUM = sum(C_LIST)                   # 128 == c_plist_sum


# --------------------------------------------------------------------------
# Parameter preparation (done ONCE, hoisted out of the forward path).
# Folds Conv1d(1,1,3,pad=1,bias=False) and the five Linear(128->C_i) layers into
# a single (128, 128) effective weight and a (1, 128) bias:
#   att_i = sigmoid(mean @ W_eff + b)[:, off_i:off_i+C_i]
# --------------------------------------------------------------------------
def prepare_params(conv_w, lin_weights, lin_biases):
    w_cat = jnp.concatenate([jnp.asarray(w).T for w in lin_weights], axis=1)  # (128,128)
    b_cat = jnp.concatenate([jnp.asarray(b).reshape(-1) for b in lin_biases])
    b_cat = b_cat.reshape(1, -1).astype(jnp.float32)                          # (1,128)

    cw = jnp.asarray(conv_w).reshape(-1).astype(jnp.float32)                  # (3,)
    n = w_cat.shape[0]
    # conv(att)[:, j] = w0*att[:, j-1] + w1*att[:, j] + w2*att[:, j+1]  (zero pad)
    # == att @ T  with T tridiagonal:
    t_mat = (cw[0] * jnp.eye(n, k=1, dtype=jnp.float32)
             + cw[1] * jnp.eye(n, dtype=jnp.float32)
             + cw[2] * jnp.eye(n, k=-1, dtype=jnp.float32))
    w_eff = (t_mat @ w_cat.astype(jnp.float32)).astype(jnp.float32)           # (128,128)
    return w_eff, b_cat


# --------------------------------------------------------------------------
# Bytes-balanced block selection
# --------------------------------------------------------------------------
def _pick_spatial_block(s, c, itemsize, target_bytes):
    """Spatial block so that c*blk*itemsize ~= target_bytes; multiple of 128 or full S."""
    if s * c * itemsize <= target_bytes:
        return s                                  # single full chunk (always legal)
    blk = ((target_bytes // (c * itemsize)) // 128) * 128
    blk = max(128, blk)
    if blk >= s:
        return s
    return blk


def _build_kernel(c_list, s_list, blocks, chunk_counts, num_chunks):
    offsets = [0]
    for c in c_list:
        offsets.append(offsets[-1] + c)
    n_stage = len(c_list)

    def kernel(invn_ref, w_ref, b_ref, *refs):
        t_refs = refs[:n_stage]
        out_ref = refs[n_stage]
        acc_ref = refs[n_stage + 1]
        g = pl.program_id(1)

        # ---- init accumulator at the first chunk of each batch row ----------
        @pl.when(g == 0)
        def _init():
            acc_ref[...] = jnp.zeros_like(acc_ref)

        # ---- partial channel sums, written to static lane slices ------------
        for i in range(n_stage):
            t_ref = t_refs[i]
            lo, hi = offsets[i], offsets[i + 1]
            gi, blk, s = chunk_counts[i], blocks[i], s_list[i]
            tail = s - (gi - 1) * blk            # valid lanes in the last chunk (static)
            needs_mask = (tail != blk)

            def _accum_full(t_ref=t_ref, lo=lo, hi=hi):
                x = t_ref[...].astype(jnp.float32)          # (1, C_i, blk)
                acc_ref[:, lo:hi] += jnp.sum(x, axis=-1)    # (1, C_i)

            def _accum_tail(t_ref=t_ref, lo=lo, hi=hi, tail=tail):
                x = t_ref[...].astype(jnp.float32)          # (1, C_i, blk) — tail is partial
                lane = jax.lax.broadcasted_iota(jnp.int32, x.shape, 2)
                x = jnp.where(lane < tail, x, 0.0)          # zero the out-of-bounds lanes
                acc_ref[:, lo:hi] += jnp.sum(x, axis=-1)

            if not needs_mask:
                if gi == num_chunks:
                    _accum_full()                            # contributes on every chunk
                else:
                    pl.when(g < gi)(_accum_full)             # shorter stage: skip padded steps
            else:
                if gi > 1:
                    pl.when(g < gi - 1)(_accum_full)         # full interior chunks: no mask
                pl.when(g == gi - 1)(_accum_tail)            # masked tail chunk only

        # ---- epilogue: mean -> fused (conv1d ∘ 5x Linear) -> sigmoid ---------
        @pl.when(g == num_chunks - 1)
        def _finalize():
            att = acc_ref[...] * invn_ref[...]               # (1, 128) per-channel mean
            z = jnp.dot(att, w_ref[...], preferred_element_type=jnp.float32)
            z = z + b_ref[...]
            out_ref[...] = jax.nn.sigmoid(z).astype(out_ref.dtype)[None]   # (1,1,128)

    return kernel


def channel_att_bridge(ts, w_eff, b_cat, *,
                       target_chunk_bytes=2 * 1024 * 1024,
                       vmem_workset_cap=40 * 1024 * 1024,
                       expand=False):
    """ts: list of 5 NCHW tensors (f32 or bf16); (w_eff, b_cat) from prepare_params.
    Returns 5 compact (B, C_i) attention maps (or broadcast to ts shapes if
    expand=True, matching the PyTorch expand_as output)."""
    c_list = [int(t.shape[1]) for t in ts]
    c_sum = int(w_eff.shape[0])
    assert sum(c_list) == c_sum, "channel counts must sum to the Linear in_features"
    B = int(ts[0].shape[0])
    out_dtype = ts[0].dtype

    ts_flat = [t.reshape(t.shape[0], t.shape[1], -1) for t in ts]
    s_list = [int(t.shape[-1]) for t in ts_flat]
    isz_list = [int(t.dtype.itemsize) for t in ts_flat]

    # ---- bytes-balanced per-stage blocks, capped to a v7x-safe working set ---
    target = int(target_chunk_bytes)
    while True:
        blocks = [_pick_spatial_block(s, c, isz, target)
                  for s, c, isz in zip(s_list, c_list, isz_list)]
        tile_bytes = sum(2 * c * blk * isz                        # double-buffered inputs
                         for c, blk, isz in zip(c_list, blocks, isz_list))
        param_bytes = 2 * (c_sum * c_sum + 2 * c_sum) * 4         # w_eff, inv_n, bias
        out_bytes = 2 * c_sum * int(np.dtype(out_dtype).itemsize)
        scratch_bytes = c_sum * 4
        workset = tile_bytes + param_bytes + out_bytes + scratch_bytes
        if workset <= vmem_workset_cap or target <= 64 * 1024:
            break
        target //= 2

    chunk_counts = [-(-s // blk) for s, blk in zip(s_list, blocks)]   # cdiv
    num_chunks = max(chunk_counts)

    # VMEM limit from the real working set + 25% headroom (small floor for
    # compiler-internal scratch); never near the v7x 64 MiB physical limit.
    vmem_limit = max(4 * 1024 * 1024, int(workset * 1.25))

    # 1/(H_i*W_i) per lane segment (static shapes -> baked numpy constant).
    inv_n = np.zeros((1, c_sum), np.float32)
    off = 0
    for c, s in zip(c_list, s_list):
        inv_n[0, off:off + c] = 1.0 / float(s)
        off += c
    inv_n = jnp.asarray(inv_n)

    in_specs = [
        pl.BlockSpec((1, c_sum), lambda b, g: (0, 0)),          # inv_n
        pl.BlockSpec((c_sum, c_sum), lambda b, g: (0, 0)),      # fused weight
        pl.BlockSpec((1, c_sum), lambda b, g: (0, 0)),          # fused bias
    ]
    for c, blk, gi in zip(c_list, blocks, chunk_counts):
        # Clamp the chunk index for shorter stages: the block index stops
        # changing, so no redundant DMA is issued for padded grid steps.
        in_specs.append(
            pl.BlockSpec((1, c, blk),
                         lambda b, g, gi=gi: (b, 0, jnp.minimum(g, gi - 1))))

    out_spec = pl.BlockSpec((1, 1, c_sum), lambda b, g: (b, 0, 0))
    out_shape = jax.ShapeDtypeStruct((B, 1, c_sum), out_dtype)

    kernel = _build_kernel(tuple(c_list), tuple(s_list), tuple(blocks),
                           tuple(chunk_counts), num_chunks)

    att = pl.pallas_call(
        kernel,
        out_shape=out_shape,
        grid=(B, num_chunks),
        in_specs=in_specs,
        out_specs=out_spec,
        scratch_shapes=[pltpu.VMEM((1, c_sum), jnp.float32)],
        compiler_params=pltpu.CompilerParams(
            dimension_semantics=("parallel", "arbitrary"),
            vmem_limit_bytes=vmem_limit),
    )(inv_n, w_eff, b_cat, *ts_flat)

    att = att.reshape(B, c_sum)
    offs = [0]
    for c in c_list:
        offs.append(offs[-1] + c)
    atts = tuple(att[:, offs[i]:offs[i + 1]] for i in range(len(c_list)))

    if expand:
        # Matches the PyTorch module's expand_as output shape (materializes it).
        return tuple(expand_as(a, t) for a, t in zip(atts, ts))
    return atts


def expand_as(att_vec, t):
    """PyTorch expand_as equivalent (zero-copy view in torch). Prefer fusing the
    downstream elementwise multiply instead of materializing this broadcast."""
    return jnp.broadcast_to(att_vec[:, :, None, None], t.shape)


# --------------------------------------------------------------------------
# Pure-JAX reference mirroring the PyTorch forward (split_att='fc')
# --------------------------------------------------------------------------
def _reference(ts, conv_w, lin_weights, lin_biases):
    means = [t.astype(jnp.float32).mean(axis=(2, 3)) for t in ts]   # (B, C_i)
    att = jnp.concatenate(means, axis=1)                            # (B, 128)
    pad = jnp.pad(att, ((0, 0), (1, 1)))
    conv = (conv_w[0] * pad[:, :-2] + conv_w[1] * pad[:, 1:-1]
            + conv_w[2] * pad[:, 2:])
    outs = []
    for w, b, t in zip(lin_weights, lin_biases, ts):
        a = jax.nn.sigmoid(conv @ w.T + b)                          # (B, C_i)
        outs.append(jnp.broadcast_to(a[:, :, None, None], t.shape))
    return outs


def _check(atts, refs, ts, B):
    for a, r, t in zip(atts, refs, ts):
        assert a.shape == (B, t.shape[1])
        full = np.broadcast_to(np.asarray(a, dtype=np.float32)[:, :, None, None], t.shape)
        np.testing.assert_allclose(full, np.asarray(r), rtol=1e-5, atol=1e-5)


if __name__ == "__main__":
    key = jax.random.PRNGKey(0)
    keys = jax.random.split(key, 16)

    B = 2
    # Spatial extents chosen so the small-budget run exercises multi-chunk
    # accumulation AND masked (non-dividing) tail chunks: 18*18=324, 12*12=144.
    spatial = [(18, 18), (12, 12), (8, 8), (5, 5), (4, 4)]
    ts = [jax.random.normal(keys[i], (B, C_LIST[i], h, w), dtype=jnp.float32)
          for i, (h, w) in enumerate(spatial)]

    # Conv1d(1, 1, 3, padding=1, bias=False) weight -> (3,)
    conv_w = 0.3 * jax.random.normal(keys[5], (3,), dtype=jnp.float32)
    # Linear(128, C_i) weights / biases
    lin_weights = [0.1 * jax.random.normal(keys[6 + i], (c, C_SUM), dtype=jnp.float32)
                   for i, c in enumerate(C_LIST)]
    lin_biases = [0.05 * jax.random.normal(keys[11 + i], (c,), dtype=jnp.float32)
                  for i, c in enumerate(C_LIST)]

    # Parameter prep is hoisted: done once, reused for every forward call.
    w_eff, b_cat = prepare_params(conv_w, lin_weights, lin_biases)
    refs = _reference(ts, conv_w, lin_weights, lin_biases)

    # 1) Default bytes-balanced tiling (every stage fits a single chunk here).
    atts = channel_att_bridge(ts, w_eff, b_cat)
    atts = jax.block_until_ready(atts)
    _check(atts, refs, ts, B)

    # 2) Tiny per-stage chunk budget to exercise the multi-chunk accumulation,
    #    the g < gi gating of shorter stages, and the masked tail chunks
    #    (stage 1: 3 chunks of 128 w/ tail 68; stage 2: 2 chunks w/ tail 16).
    atts2 = channel_att_bridge(ts, w_eff, b_cat, target_chunk_bytes=4096)
    atts2 = jax.block_until_ready(atts2)
    _check(atts2, refs, ts, B)

    print("KERNEL_OK")
</pallas_src>

<mosaic_0001>
module attributes {stable_mosaic.version = 11 : i64} {
  func.func @kernel(%arg0: i32, %arg1: i32, %arg2: memref<1x128xf32, #tpu.memory_space<vmem>>, %arg3: memref<128x128xf32, #tpu.memory_space<vmem>>, %arg4: memref<1x128xf32, #tpu.memory_space<vmem>>, %arg5: memref<1x8x324xf32, #tpu.memory_space<vmem>>, %arg6: memref<1x16x144xf32, #tpu.memory_space<vmem>>, %arg7: memref<1x24x64xf32, #tpu.memory_space<vmem>>, %arg8: memref<1x32x25xf32, #tpu.memory_space<vmem>>, %arg9: memref<1x48x16xf32, #tpu.memory_space<vmem>>, %arg10: memref<1x1x128xf32, #tpu.memory_space<vmem>>, %arg11: memref<1x128xf32, #tpu.memory_space<vmem>>) attributes {dimension_semantics = [#tpu.dimension_semantics<parallel>, #tpu.dimension_semantics<arbitrary>], iteration_bounds = array<i64: 2, 1>, scalar_prefetch = 0 : i64, scratch_operands = 1 : i64, tpu.core_type = #tpu.core_type<tc>, window_params = [{pipeline_mode = #tpu.pipeline_mode<synchronous>, transform_indices = @transform_0, window_bounds = array<i64: 1, 128>}, {pipeline_mode = #tpu.pipeline_mode<synchronous>, transform_indices = @transform_1, window_bounds = array<i64: 128, 128>}, {pipeline_mode = #tpu.pipeline_mode<synchronous>, transform_indices = @transform_2, window_bounds = array<i64: 1, 128>}, {transform_indices = @transform_3, window_bounds = array<i64: 1, 8, 324>}, {transform_indices = @transform_4, window_bounds = array<i64: 1, 16, 144>}, {transform_indices = @transform_5, window_bounds = array<i64: 1, 24, 64>}, {transform_indices = @transform_6, window_bounds = array<i64: 1, 32, 25>}, {transform_indices = @transform_7, window_bounds = array<i64: 1, 48, 16>}, {transform_indices = @transform_8, window_bounds = array<i64: 1, 1, 128>}]} {
    %c0_i32 = arith.constant 0 : i32
    %0 = arith.cmpi eq, %arg1, %c0_i32 : i32
    %1 = arith.extui %0 : i1 to i32
    %c0_i32_0 = arith.constant 0 : i32
    %2 = arith.cmpi ne, %1, %c0_i32_0 : i32
    scf.if %2 {
      %cst_37 = arith.constant 0.000000e+00 : f32
      %31 = vector.broadcast %cst_37 : f32 to vector<1x128xf32>
      %c0_38 = arith.constant 0 : index
      %c0_39 = arith.constant 0 : index
      %32 = vector.load %arg11[%c0_38, %c0_39] : memref<1x128xf32, #tpu.memory_space<vmem>>, vector<1x128xf32>
      tpu.vector_store %arg11[%c0_38, %c0_39], %31 {strides = array<i32>} : memref<1x128xf32, #tpu.memory_space<vmem>>, vector<1x128xf32>,
    } else {
    }
    %c0 = arith.constant 0 : index
    %c0_1 = arith.constant 0 : index
    %c0_2 = arith.constant 0 : index
    %3 = vector.load %arg5[%c0, %c0_1, %c0_2] : memref<1x8x324xf32, #tpu.memory_space<vmem>>, vector<1x8x324xf32>
    %c0_3 = arith.constant 0 : index
    %c0_4 = arith.constant 0 : index
    %4 = vector.load %arg11[%c0_3, %c0_4] : memref<1x128xf32, #tpu.memory_space<vmem>>, vector<1x8xf32>
    %cst = arith.constant dense<0.000000e+00> : vector<1x8xf32>
    %5 = vector.multi_reduction <add>, %3, %cst [2] : vector<1x8x324xf32> to vector<1x8xf32>
    %6 = arith.addf %4, %5 : vector<1x8xf32>
    %c0_5 = arith.constant 0 : index
    %c0_6 = arith.constant 0 : index
    %7 = vector.load %arg11[%c0_5, %c0_6] : memref<1x128xf32, #tpu.memory_space<vmem>>, vector<1x8xf32>
    tpu.vector_store %arg11[%c0_5, %c0_6], %6 {strides = array<i32>} : memref<1x128xf32, #tpu.memory_space<vmem>>, vector<1x8xf32>,
    %c0_7 = arith.constant 0 : index
    %c0_8 = arith.constant 0 : index
    %c0_9 = arith.constant 0 : index
    %8 = vector.load %arg6[%c0_7, %c0_8, %c0_9] : memref<1x16x144xf32, #tpu.memory_space<vmem>>, vector<1x16x144xf32>
    %c0_10 = arith.constant 0 : index
    %c8 = arith.constant 8 : index
    %9 = vector.load %arg11[%c0_10, %c8] : memref<1x128xf32, #tpu.memory_space<vmem>>, vector<1x16xf32>
    %cst_11 = arith.constant dense<0.000000e+00> : vector<1x16xf32>
    %10 = vector.multi_reduction <add>, %8, %cst_11 [2] : vector<1x16x144xf32> to vector<1x16xf32>
    %11 = arith.addf %9, %10 : vector<1x16xf32>
    %c0_12 = arith.constant 0 : index
    %c8_13 = arith.constant 8 : index
    %12 = vector.load %arg11[%c0_12, %c8_13] : memref<1x128xf32, #tpu.memory_space<vmem>>, vector<1x16xf32>
    tpu.vector_store %arg11[%c0_12, %c8_13], %11 {strides = array<i32>} : memref<1x128xf32, #tpu.memory_space<vmem>>, vector<1x16xf32>,
    %c0_14 = arith.constant 0 : index
    %c0_15 = arith.constant 0 : index
    %c0_16 = arith.constant 0 : index
    %13 = vector.load %arg7[%c0_14, %c0_15, %c0_16] : memref<1x24x64xf32, #tpu.memory_space<vmem>>, vector<1x24x64xf32>
    %c0_17 = arith.constant 0 : index
    %c24 = arith.constant 24 : index
    %14 = vector.load %arg11[%c0_17, %c24] : memref<1x128xf32, #tpu.memory_space<vmem>>, vector<1x24xf32>
    %cst_18 = arith.constant dense<0.000000e+00> : vector<1x24xf32>
    %15 = vector.multi_reduction <add>, %13, %cst_18 [2] : vector<1x24x64xf32> to vector<1x24xf32>
    %16 = arith.addf %14, %15 : vector<1x24xf32>
    %c0_19 = arith.constant 0 : index
    %c24_20 = arith.constant 24 : index
    %17 = vector.load %arg11[%c0_19, %c24_20] : memref<1x128xf32, #tpu.memory_space<vmem>>, vector<1x24xf32>
    tpu.vector_store %arg11[%c0_19, %c24_20], %16 {strides = array<i32>} : memref<1x128xf32, #tpu.memory_space<vmem>>, vector<1x24xf32>,
    %c0_21 = arith.constant 0 : index
    %c0_22 = arith.constant 0 : index
    %c0_23 = arith.constant 0 : index
    %18 = vector.load %arg8[%c0_21, %c0_22, %c0_23] : memref<1x32x25xf32, #tpu.memory_space<vmem>>, vector<1x32x25xf32>
    %c0_24 = arith.constant 0 : index
    %c48 = arith.constant 48 : index
    %19 = vector.load %arg11[%c0_24, %c48] : memref<1x128xf32, #tpu.memory_space<vmem>>, vector<1x32xf32>
    %cst_25 = arith.constant dense<0.000000e+00> : vector<1x32xf32>
    %20 = vector.multi_reduction <add>, %18, %cst_25 [2] : vector<1x32x25xf32> to vector<1x32xf32>
    %21 = arith.addf %19, %20 : vector<1x32xf32>
    %c0_26 = arith.constant 0 : index
    %c48_27 = arith.constant 48 : index
    %22 = vector.load %arg11[%c0_26, %c48_27] : memref<1x128xf32, #tpu.memory_space<vmem>>, vector<1x32xf32>
    tpu.vector_store %arg11[%c0_26, %c48_27], %21 {strides = array<i32>} : memref<1x128xf32, #tpu.memory_space<vmem>>, vector<1x32xf32>,
    %c0_28 = arith.constant 0 : index
    %c0_29 = arith.constant 0 : index
    %c0_30 = arith.constant 0 : index
    %23 = vector.load %arg9[%c0_28, %c0_29, %c0_30] : memref<1x48x16xf32, #tpu.memory_space<vmem>>, vector<1x48x16xf32>
    %c0_31 = arith.constant 0 : index
    %c80 = arith.constant 80 : index
    %24 = vector.load %arg11[%c0_31, %c80] : memref<1x128xf32, #tpu.memory_space<vmem>>, vector<1x48xf32>
    %cst_32 = arith.constant dense<0.000000e+00> : vector<1x48xf32>
    %25 = vector.multi_reduction <add>, %23, %cst_32 [2] : vector<1x48x16xf32> to vector<1x48xf32>
    %26 = arith.addf %24, %25 : vector<1x48xf32>
    %c0_33 = arith.constant 0 : index
    %c80_34 = arith.constant 80 : index
    %27 = vector.load %arg11[%c0_33, %c80_34] : memref<1x128xf32, #tpu.memory_space<vmem>>, vector<1x48xf32>
    tpu.vector_store %arg11[%c0_33, %c80_34], %26 {strides = array<i32>} : memref<1x128xf32, #tpu.memory_space<vmem>>, vector<1x48xf32>,
    %c0_i32_35 = arith.constant 0 : i32
    %28 = arith.cmpi eq, %arg1, %c0_i32_35 : i32
    %29 = arith.extui %28 : i1 to i32
    %c0_i32_36 = arith.constant 0 : i32
    %30 = arith.cmpi ne, %29, %c0_i32_36 : i32
    scf.if %30 {
      %c0_37 = arith.constant 0 : index
      %c0_38 = arith.constant 0 : index
      %31 = vector.load %arg11[%c0_37, %c0_38] : memref<1x128xf32, #tpu.memory_space<vmem>>, vector<1x128xf32>
      %c0_39 = arith.constant 0 : index
      %c0_40 = arith.constant 0 : index
      %32 = vector.load %arg2[%c0_39, %c0_40] : memref<1x128xf32, #tpu.memory_space<vmem>>, vector<1x128xf32>
      %33 = arith.mulf %31, %32 : vector<1x128xf32>
      %c0_41 = arith.constant 0 : index
      %c0_42 = arith.constant 0 : index
      %34 = vector.load %arg3[%c0_41, %c0_42] : memref<128x128xf32, #tpu.memory_space<vmem>>, vector<128x128xf32>
      %cst_43 = arith.constant dense<0.000000e+00> : vector<1x128xf32>
      %35 = tpu.matmul %33, %34, %cst_43 {dimension_numbers = #tpu.dot_dimension_numbers<[1], [0], [0], [1], [0, 0, 1, 1], [], []>} : vector<1x128xf32>, vector<128x128xf32>, vector<1x128xf32> -> vector<1x128xf32>
      %c0_44 = arith.constant 0 : index
      %c0_45 = arith.constant 0 : index
      %36 = vector.load %arg4[%c0_44, %c0_45] : memref<1x128xf32, #tpu.memory_space<vmem>>, vector<1x128xf32>
      %37 = arith.addf %35, %36 : vector<1x128xf32>
      %38 = arith.negf %37 : vector<1x128xf32>
      %39 = math.exp %38 : vector<1x128xf32>
      %cst_46 = arith.constant 1.000000e+00 : f32
      %40 = vector.broadcast %cst_46 : f32 to vector<1x128xf32>
      %41 = arith.addf %40, %39 : vector<1x128xf32>
      %42 = arith.divf %40, %41 : vector<1x128xf32>
      %43 = vector.shape_cast %42 : vector<1x128xf32> to vector<1x1x128xf32>
      %c0_47 = arith.constant 0 : index
      %c0_48 = arith.constant 0 : index
      %c0_49 = arith.constant 0 : index
      %44 = vector.load %arg10[%c0_47, %c0_48, %c0_49] : memref<1x1x128xf32, #tpu.memory_space<vmem>>, vector<1x1x128xf32>
      tpu.vector_store %arg10[%c0_47, %c0_48, %c0_49], %43 {strides = array<i32>} : memref<1x1x128xf32, #tpu.memory_space<vmem>>, vector<1x1x128xf32>,
    } else {
    }
    return
  }
  func.func @transform_0(%arg0: i32, %arg1: i32) -> (i32, i32) {
    %c0_i32 = arith.constant 0 : i32
    %c0_i32_0 = arith.constant 0 : i32
    %c0_i32_1 = arith.constant 0 : i32
    return %c0_i32, %c0_i32_0 : i32, i32
  }
  func.func @transform_1(%arg0: i32, %arg1: i32) -> (i32, i32) {
    %c0_i32 = arith.constant 0 : i32
    %c0_i32_0 = arith.constant 0 : i32
    %c0_i32_1 = arith.constant 0 : i32
    return %c0_i32, %c0_i32_0 : i32, i32
  }
  func.func @transform_2(%arg0: i32, %arg1: i32) -> (i32, i32) {
    %c0_i32 = arith.constant 0 : i32
    %c0_i32_0 = arith.constant 0 : i32
    %c0_i32_1 = arith.constant 0 : i32
    return %c0_i32, %c0_i32_0 : i32, i32
  }
  func.func @transform_3(%arg0: i32, %arg1: i32) -> (i32, i32, i32) {
    %c0_i32 = arith.constant 0 : i32
    %0 = arith.minsi %arg1, %c0_i32 : i32
    %c0_i32_0 = arith.constant 0 : i32
    %c0_i32_1 = arith.constant 0 : i32
    return %arg0, %c0_i32_0, %0 : i32, i32, i32
  }
  func.func @transform_4(%arg0: i32, %arg1: i32) -> (i32, i32, i32) {
    %c0_i32 = arith.constant 0 : i32
    %0 = arith.minsi %arg1, %c0_i32 : i32
    %c0_i32_0 = arith.constant 0 : i32
    %c0_i32_1 = arith.constant 0 : i32
    return %arg0, %c0_i32_0, %0 : i32, i32, i32
  }
  func.func @transform_5(%arg0: i32, %arg1: i32) -> (i32, i32, i32) {
    %c0_i32 = arith.constant 0 : i32
    %0 = arith.minsi %arg1, %c0_i32 : i32
    %c0_i32_0 = arith.constant 0 : i32
    %c0_i32_1 = arith.constant 0 : i32
    return %arg0, %c0_i32_0, %0 : i32, i32, i32
  }
  func.func @transform_6(%arg0: i32, %arg1: i32) -> (i32, i32, i32) {
    %c0_i32 = arith.constant 0 : i32
    %0 = arith.minsi %arg1, %c0_i32 : i32
    %c0_i32_0 = arith.constant 0 : i32
    %c0_i32_1 = arith.constant 0 : i32
    return %arg0, %c0_i32_0, %0 : i32, i32, i32
  }
  func.func @transform_7(%arg0: i32, %arg1: i32) -> (i32, i32, i32) {
    %c0_i32 = arith.constant 0 : i32
    %0 = arith.minsi %arg1, %c0_i32 : i32
    %c0_i32_0 = arith.constant 0 : i32
    %c0_i32_1 = arith.constant 0 : i32
    return %arg0, %c0_i32_0, %0 : i32, i32, i32
  }
  func.func @transform_8(%arg0: i32, %arg1: i32) -> (i32, i32, i32) {
    %c0_i32 = arith.constant 0 : i32
    %c0_i32_0 = arith.constant 0 : i32
    %c0_i32_1 = arith.constant 0 : i32
    return %arg0, %c0_i32, %c0_i32_0 : i32, i32, i32
  }
}

</mosaic_0001>

<bundles_post_ra>
// kernel: tpu_custom_call.1
= control target key start
LH: loop header
LB: loop body
LE: loop exit
PB: predicated region body
PF: predicated region fallthrough
CT: control target
= control target key end

     0   :  { %13 = vsyncpa [#allocation4], 0  ;;  %s1840_s0 = inlined_call_operand.vmem [shape: f32[1,128], index: 0, kind: input, shape index: {}]   ;;  %s1841_s1 = inlined_call_operand.vmem [shape: f32[128,128], index: 1, kind: input, shape index: {}]   ;;  %s1842_s2 = inlined_call_operand.vmem [shape: f32[1,128], index: 2, kind: input, shape index: {}]   ;;  %s1843_s3 = inlined_call_operand.hbm [shape: f32[2,8,324], index: 3, kind: input, shape index: {}]   ;;  %s1844_s4 = inlined_call_operand.vmem [shape: f32[2,16,144], index: 4, kind: input, shape index: {}]   ;;  %s1845_s5 = inlined_call_operand.hbm [shape: f32[2,24,64], index: 5, kind: input, shape index: {}]   ;;  %s1846_s6 = inlined_call_operand.vmem [shape: f32[2,32,25], index: 6, kind: input, shape index: {}]   ;;  %s1847_s7 = inlined_call_operand.vmem [shape: f32[2,48,16], index: 7, kind: input, shape index: {}]   ;;  %s1848_s8 = inlined_call_operand.hbm [shape: f32[2,1,128], index: 8, kind: output, shape index: {}]  }
   0x1   :  { %15 = vsyncpa [#allocation4 + $0x1], 0 }
   0x2   :  { %16 = vsyncpa [#allocation7], 0 }
   0x3   :  { %18 = vsyncpa [#allocation7 + $0x1], 0 }
   0x4   :  { %19 = vsyncpa [#allocation5], 0 }
   0x5   :  { %21 = vsyncpa [#allocation5 + $0x1], 0  ;;  %s1603_s27 = smov 0   ;;  %s1605_s28 = smov 0  }
   0x6   :  { %s1607_s29 = smov 0   ;;  %s1609_s30 = smov 0  }
   0x7   :  { %s1611_s9 = smov 0   ;;  %s1613_s10 = smov 0  }
   0x8 LB: > { %1854 = sst [smem:[#allocation12_spill]] %s1532_s27  ;;  %s1305_s11 = sadd.s32 4294967295, %s1552_s10   ;;  %s1552_s10 = sphi %s1613_s10, %s27_s10   ;;  %s1548_s9 = sphi %s1611_s9, %s1870_s9   ;;  %s1544_s30 = sphi %s1609_s30, %s1869_s30   ;;  %s1540_s29 = sphi %s1607_s29, %s1868_s29   ;;  %s1536_s28 = sphi %s1605_s28, %s1872_s28   ;;  %s1532_s27 = sphi %s1603_s27, %s1871_s27  }
   0x9   : > { %1855 = sst [smem:[#allocation13_spill]] %s1540_s29  ;;  %s1306_s12 = sadd.s32 4294967294, %s1552_s10  }
   0xa   : > { %1856 = sst [smem:[#allocation14_spill]] %s1548_s9  ;;  %s39_s13 = sadd.s32 1, %s1548_s9 }
   0xb   : > { %s115_s14 = sadd.s32 1, %s1540_s29  ;;  %p41_p0 = scmp.ge.s32.totalorder %s39_s13, 2 }
   0xc   : > { %p122_p1 = scmp.ne.s32.totalorder %s1540_s29, %s1536_s28  ;;  %p123_p2 = scmp.eq.s32.totalorder %s1552_s10, 0 }
   0xd   : > { %p128_p3 = scmp.ne.s32.totalorder %s1536_s28, %s1532_s27  ;;  %s1874_s13 = smov (%p41_p0, %s39_s13), 0 }
   0xe   : > { %1857 = sst [smem:[#allocation15_spill]] %s1874_s13  ;;  %p1644_p4 = por %p123_p2, %p122_p1 }
   0xf   : > { %p129_p5 = scmp.eq.s32.totalorder %s1305_s11, 0  ;;  %s110_s16 = ssub.s32 %s1548_s9, %s1874_s13 }
  0x10   : > { %p280_p6 = scmp.eq.s32.totalorder %s1305_s11, 1  ;;  %p113_p7 = scmp.eq.s32.totalorder %s110_s16, 0 }
  0x11   : > { %p1650_p8 = por %p129_p5, %p128_p3  ;;  %p286_p10 = scmp.eq.s32.totalorder %s1306_s12, 1 }
  0x12   : > { %p1654_p9 = por %p280_p6, %p122_p1  ;;  %p1308_p12 = scmp.ge.s32.totalorder %s1552_s10, 2 }
  0x13   : > { %s1659_s19 = scalar_select %p113_p7, %s1540_s29, %s115_s14  }
  0x14   : > { %p1661_p11 = por %p286_p10, %p128_p3  ;;  %p1345_p13 = scmp.lt.s32.totalorder %s1552_s10, 2 }
  0x15   : > { %1861 = sst [smem:[#allocation16_spill]] %s1659_s19  ;;  %s1668_s21 = sand.u32 1, %s1540_s29  }
  0x16   : > { %s1862_s20 = scalar_select %p1661_p11, 1, 0 }
  0x17   : > { %s1322_s22 = smul.u32 24, %s1668_s21  ;;  %p1674_p0 = pnand %p1345_p13, %p1644_p4 }
  0x18   : > { %1863 = sst [smem:[#allocation17_spill]] %s1862_s20  ;;  %s1323_s23 = smul.u32 24, %s1548_s9 }
  0x19   : > { %s319_s12 = scalar_lea.vmem [#allocation3], %s1322_s22  ;;  %s316_s13 = scalar_lea.sflag [#allocation4], %s1668_s21 }
  0x1a   : > { %s328_s11 = scalar_lea.hbm %s1843_s3, %s1323_s23  ;;  %s332_s14 = sshll.u32 %s319_s12, 4  ;;  %s333_s14 = int_to_ptr.vmem [resolvable:$true] %s332_s14 }
  0x1b   : > { %s330_s16 = sshll.u32 %s328_s11, 4  ;;  %s368_s19 = scalar_lea.hbm %s1845_s5, %s1323_s23  ;;  %s331_s16 = int_to_ptr.hbm [resolvable:$true] %s330_s16 }
  0x1c   : > { %1337 = dma.hbm_to_vmem [thread:$0]  (!%p1674_p0), %s331_s16, 384, %s333_s14, %s316_s13  }
  0x1d   : > { %s369_s29 = sshll.u32 %s368_s19, 4  ;;  %s360_s20 = scalar_lea.vmem [#allocation6], %s1322_s22  ;;  %s370_s29 = int_to_ptr.hbm [resolvable:$true] %s369_s29 }
  0x1e   : > { %s371_s27 = sshll.u32 %s360_s20, 4  ;;  %p1311_p1 = scmp.ge.s32.totalorder %s1552_s10, 1  ;;  %s372_s27 = int_to_ptr.vmem [resolvable:$true] %s371_s27 }
  0x1f   : > { %p409_p2 = scmp.lt.s32.totalorder %s1552_s10, 3  ;;  %s357_s25 = scalar_lea.sflag [#allocation7], %s1668_s21 }
  0x20   : > { %s1554_s26 = smov 128   ;;  %s1555_s11 = smov 8  }
  0x21   : > { %p410_p3 = pnand %p1311_p1, %p409_p2 }
  0x22   : > { %1340 = dma.hbm_to_vmem [thread:$0]  (!%p1674_p0), %s370_s29, 384, %s372_s27, %s357_s25, %s1554_s26, %s1554_s26, %s1555_s11  }
  0x23   : > { %413 = sbr.rel (%p410_p3) target bundleno = 695 (0x2b7), region = 52  ;;  %s1693_s13 = sand.u32 (!%p410_p3), 1, %s1536_s28  }
  0x24   : > { %s1326_s9 = smul.u32 (!%p410_p3), 24, %s1693_s13  ;;  %s416_s19 = scalar_lea.sflag (!%p410_p3), [#allocation4], %s1693_s13 }
  0x26   : > { %s419_s20 = scalar_lea.vmem (!%p410_p3), [#allocation3], %s1326_s9 }
  0x28   : > { %1519 = dma.done.wait (%p1650_p8), %s416_s19, 384  }
  0x29   : > { %1521 = vsyncadd (%p1650_p8), %s416_s19, 4294966912  ;;  %s426_s21 = scalar_lea.sflag [#allocation7], %s1693_s13  ;;  %s429_s22 = scalar_lea.vmem [#allocation6], %s1326_s9 }
  0x2a   : > { %1523 = dma.done.wait (%p1650_p8), %s426_s21, 384  }
  0x2b   : > { %1525 = vsyncadd (%p1650_p8), %s426_s21, 4294966912  ;;  %p504_p4 = scmp.lt.s32.totalorder %s1544_s30, 1  ;;  %vm551_vm0 = vcmask 556032   ;;  %v546_v0 = vld [vmem:[%s419_s20] sm:$0xff]  ;;  %v547_v1 = vld [vmem:[%s419_s20 + $0x8] sm:$0xff]  ;;  %vm596_vm1 = vcmask 130048  }
  0x2c   : > { %v548_v2 = vld [vmem:[%s419_s20 + $0x10] sm:$0xff]  ;;  %v550_v3 = vadd.f32 %v547_v1, %v546_v0  ;;  %v665_v7 = vld [vmem:[%s429_s22 + $0x8] sm:$0xff]  ;;  %vm668_vm2 = vcmask 523264   ;;  %v666_v15 = vld [vmem:[%s429_s22 + $0x10] sm:$0xff]  ;;  %vm767_vm3 = vcmask 203776   ;;  %v1556_v40 = vmov 0  }
  0x2d   : > { %s1708_s27 = scalar_select %p504_p4, %s1544_s30, 1  ;;  %v552_v4 = vsel %vm551_vm0, %v548_v2, 0.0  ;;  %v672_v12 = vsel %vm668_vm2, %v665_v7, 0.0  ;;  %v664_v16 = vld [vmem:[%s429_s22] sm:$0xff]  ;;  %v675_v18 = vsel %vm668_vm2, %v666_v15, 0.0  ;;  %1399 = vset.pattern.permute.xlu1 %v1556_v40  ;;  %1400 = vset.pattern.permute.xlu2 %v1556_v40  ;;  %vm589_vm4 = vcmask 57344  }
  0x2e   : > { %v553_v8 = vadd.f32 %v552_v4, %v550_v3  ;;  %673 = vadd.xlane.f32.xlu2 %v672_v12  ;;  %v669_v19 = vsel %vm668_vm2, %v664_v16, 0.0  ;;  %1401 = vset.pattern.permute.xlu0 %v1556_v40  ;;  %vm658_vm5 = vcmask 195712   ;;  %vm662_vm6 = vcmask 188480   ;;  %s1145_s22 = scalar_lea.hbm %s1848_s8, %s1544_s30  ;;  %s1137_s30 = scalar_lea.sflag [#allocation5], %s1693_s13 }
  0x2f   : > { %s1320_s29 = sshll.u32 %s1708_s27, 5  ;;  %s1327_s15 = smul.u32 48, %s1708_s27  ;;  %vm752_vm7 = vcmask 326912   ;;  %vm756_vm8 = vcmask 392512   ;;  %vm760_vm9 = vcmask 385216   ;;  %vm875_vm10 = vcmask 523712  }
  0x30   : > { %s511_s12 = scalar_lea.vmem %s1844_s4, %s1320_s29  ;;  %554 = vadd.xlane.f32.xlu0 %v553_v8  ;;  %s526_s16 = scalar_lea.vmem %s1846_s6, %s1320_s29  ;;  %vm879_vm11 = vcmask 589312   ;;  %vm883_vm12 = vcmask 654912   ;;  %vm887_vm13 = vcmask 647552   ;;  %vm1051_vm14 = vcmask 786112  }
  0x31   : > { %v593_v5 = vld [vmem:[%s511_s12 + $0x10] sm:$0xff]  ;;  %v594_v6 = vld [vmem:[%s511_s12 + $0x18] sm:$0xff]  ;;  %v592_v9 = vld [vmem:[%s511_s12 + $0x8] sm:$0xff]  ;;  %s538_s11 = scalar_lea.vmem %s1847_s7, %s1327_s15  ;;  %vm1055_vm15 = vcmask 851712   ;;  %vm1059_vm0 = vcmask 917312   ;;  %vm1067_vm2 = vcmask 1048512  }
  0x32   : > { %v601_v10 = vsel %vm596_vm1, %v594_v6, 0.0  ;;  %v591_v13 = vld [vmem:[%s511_s12] sm:$0xff]  ;;  %v597_v14 = vsel %vm596_vm1, %v592_v9, 0.0  ;;  %v764_v21 = vld [vmem:[%s526_s16 + $0x10] sm:$0xff]  ;;  %v763_v22 = vld [vmem:[%s526_s16 + $0x8] sm:$0xff]  ;;  %s497_s27 = scalar_lea.vmem [#allocation8], %s1693_s13 }
  0x33   : > { %v602_v11 = vadd.f32 %v601_v10, %v593_v5  ;;  %v598_v17 = vadd.f32 %v597_v14, %v591_v13  ;;  %v762_v20 = vld [vmem:[%s526_s16] sm:$0xff]  ;;  %v774_v24 = vsel %vm767_vm3, %v764_v21, 0.0  ;;  %v771_v25 = vsel %vm767_vm3, %v763_v22, 0.0  ;;  %v765_v26 = vld [vmem:[%s526_s16 + $0x18] sm:$0xff]  ;;  %v890_v27 = vld [vmem:[%s538_s11 + $0x8] sm:$0xff]  ;;  %s1147_s29 = sshll.u32 %s497_s27, 4  ;;  %s1148_s29 = int_to_ptr.vmem [resolvable:$true] %s1147_s29 }
  0x34   : > { %v768_v23 = vsel %vm767_vm3, %v762_v20, 0.0  ;;  %v889_v28 = vld [vmem:[%s538_s11] sm:$0xff]  ;;  %v777_v29 = vsel %vm767_vm3, %v765_v26, 0.0  ;;  %v899_v30 = vsel %vm596_vm1, %v890_v27, 0.0  ;;  %v891_v32 = vld [vmem:[%s538_s11 + $0x10] sm:$0xff]  ;;  %v892_v34 = vld [vmem:[%s538_s11 + $0x18] sm:$0xff] }
  0x35   : > { %603 = vadd.xlane.f32.xlu1 %v602_v11  ;;  %v896_v31 = vsel %vm596_vm1, %v889_v28, 0.0  ;;  %v893_v33 = vld [vmem:[%s538_s11 + $0x20] sm:$0xff]  ;;  %v902_v35 = vsel %vm596_vm1, %v891_v32, 0.0  ;;  %v905_v37 = vsel %vm596_vm1, %v892_v34, 0.0  ;;  %v894_v38 = vld [vmem:[%s538_s11 + $0x28] sm:$0xff]  ;;  %vm1071_vm3 = vcmask 1041024  }
  0x36   : > { %676 = vadd.xlane.f32.xlu2 %v675_v18  ;;  %v908_v36 = vsel %vm596_vm1, %v893_v33, 0.0  ;;  %v911_v39 = vsel %vm596_vm1, %v894_v38, 0.0  ;;  %vm1063_vm1 = vcmask 982912   ;;  %s1149_s23 = sshll.u32 %s1145_s22, 4  ;;  %s1486_s16 = scalar_lea.hbm %s1848_s8, 2  ;;  %s1150_s23 = int_to_ptr.hbm [resolvable:$true] %s1149_s23 }
  0x37   : > { %s1480_s24 = sshra.s32 %s1150_s23, 4  ;;  %s1481_s24 = int_to_ptr.hbm [resolvable:$true] %s1480_s24 }
  0x38   : > { %599 = vadd.xlane.f32.xlu0 %v598_v17  ;;  %s1482_s12 = scalar_lea.hbm %s1481_s24, 1  ;;  %p1487_p8 = scmp.lt.s32.totalorder %s1481_s24, %s1848_s8 }
  0x39   : > { %p1483_p5 = scmp.ne.s32.totalorder %s1481_s24, %s1482_s12  ;;  %p1488_p10 = scmp.lt.s32.totalorder %s1486_s16, %s1482_s12 }
  0x3b   : > { %p1484_p6 = pnand %p1483_p5, %p1654_p9  ;;  %p1489_p13 = por %p1488_p10, %p1487_p8 }
  0x3d   : > { %670 = vadd.xlane.f32.xlu1 %v669_v19  ;;  %p1485_p7 = pneg %p1484_p6 }
  0x3e   : > { %775 = vadd.xlane.f32.xlu2 %v774_v24 }
  0x3f   : > { %p1490_p0 = pnand %p1489_p13, %p1485_p7 }
  0x40   : > { %769 = vadd.xlane.f32.xlu0 %v768_v23 }
  0x45   : > { %772 = vadd.xlane.f32.xlu1 %v771_v25 }
  0x46   : > { %900 = vadd.xlane.f32.xlu2 %v899_v30 }
  0x48   : > { %778 = vadd.xlane.f32.xlu0 %v777_v29 }
  0x4d   : > { %897 = vadd.xlane.f32.xlu1 %v896_v31 }
  0x4e   : > { %909 = vadd.xlane.f32.xlu2 %v908_v36 }
  0x50   : > { %903 = vadd.xlane.f32.xlu0 %v902_v35 }
  0x55   : > { %906 = vadd.xlane.f32.xlu1 %v905_v37 }
  0x58   : > { %912 = vadd.xlane.f32.xlu0 %v911_v39 }
  0xa1   : > { %v674_v16 = vpop.xlane.xlu2 %673 }
  0xa2   : > { %v689_v17 = vperm.slane %v674_v16, 0  ;;  %v690_v18 = vperm.slane %v674_v16, 1  ;;  %v691_v19 = vperm.slane %v674_v16, 2  ;;  %v692_v21 = vperm.slane %v674_v16, 3 }
  0xa3   : > { %v555_v41 = vpop.xlane.xlu0 %554  ;;  %v693_v22 = vperm.slane %v674_v16, 4  ;;  %v694_v23 = vperm.slane %v674_v16, 5  ;;  %v695_v24 = vperm.slane %v674_v16, 6  ;;  %v696_v25 = vperm.slane %v674_v16, 7 }
  0xa4   : > { %v557_v42 = vperm.slane %v555_v41, 0  ;;  %v558_v43 = vperm.slane %v555_v41, 1  ;;  %v559_v44 = vperm.slane %v555_v41, 2  ;;  %v560_v45 = vperm.slane %v555_v41, 3 }
  0xa5   : > { %v561_v46 = vperm.slane %v555_v41, 4  ;;  %v562_v47 = vperm.slane %v555_v41, 5  ;;  %v563_v48 = vperm.slane %v555_v41, 6  ;;  %v564_v49 = vperm.slane %v555_v41, 7 }
  0xa6   : > { %565 = vst [vmem:[#allocation1] ss:$9 sm:$0xff] %v557_v42 }
  0xa7   : > { %567 = vst [vmem:[#allocation1 + $0x1] ss:$9 sm:$0xff] %v558_v43 }
  0xa8   : > { %569 = vst [vmem:[#allocation1 + $0x2] ss:$9 sm:$0xff] %v559_v44  ;;  %v604_v60 = vpop.xlane.xlu1 %603 }
  0xa9   : > { %571 = vst [vmem:[#allocation1 + $0x3] ss:$9 sm:$0xff] %v560_v45  ;;  %v615_v61 = vperm.slane %v604_v60, 0  ;;  %v616_v62 = vperm.slane %v604_v60, 1  ;;  %v617_v63 = vperm.slane %v604_v60, 2  ;;  %v618_v1 = vperm.slane %v604_v60, 3  ;;  %v677_v26 = vpop.xlane.xlu2 %676 }
  0xaa   : > { %573 = vst [vmem:[#allocation1 + $0x4] ss:$9 sm:$0xff] %v561_v46  ;;  %v619_v2 = vperm.slane %v604_v60, 4  ;;  %v620_v3 = vperm.slane %v604_v60, 5  ;;  %v621_v4 = vperm.slane %v604_v60, 6  ;;  %v622_v5 = vperm.slane %v604_v60, 7 }
  0xab   : > { %575 = vst [vmem:[#allocation1 + $0x5] ss:$9 sm:$0xff] %v562_v47  ;;  %v600_v50 = vpop.xlane.xlu0 %599  ;;  %v697_v27 = vperm.slane %v677_v26, 0  ;;  %v698_v28 = vperm.slane %v677_v26, 1  ;;  %v699_v29 = vperm.slane %v677_v26, 2  ;;  %v700_v31 = vperm.slane %v677_v26, 3 }
  0xac   : > { %577 = vst [vmem:[#allocation1 + $0x6] ss:$9 sm:$0xff] %v563_v48  ;;  %v607_v51 = vperm.slane %v600_v50, 0  ;;  %v608_v52 = vperm.slane %v600_v50, 1  ;;  %v609_v53 = vperm.slane %v600_v50, 2  ;;  %v610_v55 = vperm.slane %v600_v50, 3 }
  0xad   : > { %579 = vst [vmem:[#allocation1 + $0x7] ss:$9 sm:$0xff] %v564_v49  ;;  %v611_v56 = vperm.slane %v600_v50, 4  ;;  %v612_v57 = vperm.slane %v600_v50, 5  ;;  %v613_v58 = vperm.slane %v600_v50, 6  ;;  %v614_v59 = vperm.slane %v600_v50, 7 }
  0xae   : > { %v701_v32 = vperm.slane %v677_v26, 4  ;;  %v702_v33 = vperm.slane %v677_v26, 5  ;;  %v703_v34 = vperm.slane %v677_v26, 6  ;;  %v704_v35 = vperm.slane %v677_v26, 7 }
  0xb0   : > { %v671_v6 = vpop.xlane.xlu1 %670 }
  0xb1   : > { %v681_v7 = vperm.slane %v671_v6, 0  ;;  %v682_v8 = vperm.slane %v671_v6, 1  ;;  %v683_v9 = vperm.slane %v671_v6, 2  ;;  %v684_v11 = vperm.slane %v671_v6, 3 }
  0xb2   : > { %v685_v12 = vperm.slane %v671_v6, 4  ;;  %v686_v13 = vperm.slane %v671_v6, 5  ;;  %v687_v14 = vperm.slane %v671_v6, 6  ;;  %v688_v15 = vperm.slane %v671_v6, 7 }
  0xb3   : > { %v770_v36 = vpop.xlane.xlu0 %769 }
  0xb4   : > { %v580_v54 = vld [vmem:[#allocation1] sm:$0xff]  ;;  %v784_v37 = vperm.slane %v770_v36, 0  ;;  %v785_v38 = vperm.slane %v770_v36, 1  ;;  %v786_v39 = vperm.slane %v770_v36, 2  ;;  %v787_v41 = vperm.slane %v770_v36, 3 }
  0xb5   : > { %623 = vst [vmem:[#allocation1] ss:$9 sm:$0xff] %v607_v51  ;;  %582 = vperm.xlu1 %1399, %v580_v54   ;;  %v788_v42 = vperm.slane %v770_v36, 4  ;;  %v789_v43 = vperm.slane %v770_v36, 5  ;;  %v790_v44 = vperm.slane %v770_v36, 6  ;;  %v791_v45 = vperm.slane %v770_v36, 7 }
  0xb6   : > { %625 = vst [vmem:[#allocation1 + $0x1] ss:$9 sm:$0xff] %v608_v52 }
  0xb7   : > { %627 = vst [vmem:[#allocation1 + $0x2] ss:$9 sm:$0xff] %v609_v53 }
  0xb8   : > { %629 = vst [vmem:[#allocation1 + $0x3] ss:$9 sm:$0xff] %v610_v55  ;;  %v773_v46 = vpop.xlane.xlu1 %772 }
  0xb9   : > { %631 = vst [vmem:[#allocation1 + $0x4] ss:$9 sm:$0xff] %v611_v56  ;;  %v792_v47 = vperm.slane %v773_v46, 0  ;;  %v793_v48 = vperm.slane %v773_v46, 1  ;;  %v794_v49 = vperm.slane %v773_v46, 2  ;;  %v795_v51 = vperm.slane %v773_v46, 3  ;;  %v776_v56 = vpop.xlane.xlu2 %775 }
  0xba   : > { %633 = vst [vmem:[#allocation1 + $0x5] ss:$9 sm:$0xff] %v612_v57  ;;  %v796_v52 = vperm.slane %v773_v46, 4  ;;  %v797_v53 = vperm.slane %v773_v46, 5  ;;  %v798_v54 = vperm.slane %v773_v46, 6  ;;  %v799_v55 = vperm.slane %v773_v46, 7 }
  0xbb   : > { %635 = vst [vmem:[#allocation1 + $0x6] ss:$9 sm:$0xff] %v613_v58  ;;  %v800_v57 = vperm.slane %v776_v56, 0  ;;  %v801_v58 = vperm.slane %v776_v56, 1 }
  0xbc   : > { %637 = vst [vmem:[#allocation1 + $0x7] ss:$9 sm:$0xff] %v614_v59  ;;  %v802_v59 = vperm.slane %v776_v56, 2 }
  0xc3   : > { %v638_v0 = vld [vmem:[#allocation1] sm:$0xff] }
  0xc4   : > { %639 = vst [vmem:[#allocation1] ss:$9 sm:$0xff] %v615_v61  ;;  %649 = vperm.xlu2 %1400, %v638_v0   ;;  %v803_v61 = vperm.slane %v776_v56, 3  ;;  %v806_v0 = vperm.slane %v776_v56, 6 }
  0xc5   : > { %640 = vst [vmem:[#allocation1 + $0x1] ss:$9 sm:$0xff] %v616_v62  ;;  %v804_v62 = vperm.slane %v776_v56, 4 }
  0xc6   : > { %641 = vst [vmem:[#allocation1 + $0x2] ss:$9 sm:$0xff] %v617_v63  ;;  %v805_v63 = vperm.slane %v776_v56, 5 }
  0xc7   : > { %642 = vst [vmem:[#allocation1 + $0x3] ss:$9 sm:$0xff] %v618_v1  ;;  %v807_v1 = vperm.slane %v776_v56, 7 }
  0xc8   : > { %643 = vst [vmem:[#allocation1 + $0x4] ss:$9 sm:$0xff] %v619_v2  ;;  %v779_v2 = vpop.xlane.xlu0 %778 }
  0xc9   : > { %644 = vst [vmem:[#allocation1 + $0x5] ss:$9 sm:$0xff] %v620_v3  ;;  %v808_v3 = vperm.slane %v779_v2, 0 }
  0xca   : > { %645 = vst [vmem:[#allocation1 + $0x6] ss:$9 sm:$0xff] %v621_v4  ;;  %v809_v4 = vperm.slane %v779_v2, 1 }
  0xcb   : > { %646 = vst [vmem:[#allocation1 + $0x7] ss:$9 sm:$0xff] %v622_v5  ;;  %v810_v5 = vperm.slane %v779_v2, 2 }
  0xd2   : > { %v647_v10 = vld [vmem:[#allocation1] sm:$0xff] }
  0xd3   : > { %705 = vst [vmem:[#allocation1] ss:$9 sm:$0xff] %v681_v7  ;;  %652 = vperm.xlu0 %1401, %v647_v10   ;;  %v811_v7 = vperm.slane %v779_v2, 3  ;;  %v814_v10 = vperm.slane %v779_v2, 6 }
  0xd4   : > { %707 = vst [vmem:[#allocation1 + $0x1] ss:$9 sm:$0xff] %v682_v8  ;;  %v812_v8 = vperm.slane %v779_v2, 4 }
  0xd5   : > { %709 = vst [vmem:[#allocation1 + $0x2] ss:$9 sm:$0xff] %v683_v9  ;;  %v813_v9 = vperm.slane %v779_v2, 5 }
  0xd6   : > { %711 = vst [vmem:[#allocation1 + $0x3] ss:$9 sm:$0xff] %v684_v11  ;;  %v815_v11 = vperm.slane %v779_v2, 7 }
  0xd7   : > { %713 = vst [vmem:[#allocation1 + $0x4] ss:$9 sm:$0xff] %v685_v12  ;;  %v898_v12 = vpop.xlane.xlu1 %897 }
  0xd8   : > { %715 = vst [vmem:[#allocation1 + $0x5] ss:$9 sm:$0xff] %v686_v13  ;;  %v920_v13 = vperm.slane %v898_v12, 0 }
  0xd9   : > { %717 = vst [vmem:[#allocation1 + $0x6] ss:$9 sm:$0xff] %v687_v14  ;;  %v921_v14 = vperm.slane %v898_v12, 1 }
  0xda   : > { %719 = vst [vmem:[#allocation1 + $0x7] ss:$9 sm:$0xff] %v688_v15  ;;  %v922_v15 = vperm.slane %v898_v12, 2 }
  0xe1   : > { %v720_v20 = vld [vmem:[#allocation1] sm:$0xff] }
  0xe2   : > { %721 = vst [vmem:[#allocation1] ss:$9 sm:$0xff] %v689_v17  ;;  %740 = vperm.xlu2 %1400, %v720_v20   ;;  %v923_v17 = vperm.slane %v898_v12, 3  ;;  %v926_v20 = vperm.slane %v898_v12, 6 }
  0xe3   : > { %722 = vst [vmem:[#allocation1 + $0x1] ss:$9 sm:$0xff] %v690_v18  ;;  %v924_v18 = vperm.slane %v898_v12, 4 }
  0xe4   : > { %723 = vst [vmem:[#allocation1 + $0x2] ss:$9 sm:$0xff] %v691_v19  ;;  %v925_v19 = vperm.slane %v898_v12, 5 }
  0xe5   : > { %724 = vst [vmem:[#allocation1 + $0x3] ss:$9 sm:$0xff] %v692_v21  ;;  %v927_v21 = vperm.slane %v898_v12, 7 }
  0xe6   : > { %725 = vst [vmem:[#allocation1 + $0x4] ss:$9 sm:$0xff] %v693_v22  ;;  %v901_v22 = vpop.xlane.xlu2 %900 }
  0xe7   : > { %726 = vst [vmem:[#allocation1 + $0x5] ss:$9 sm:$0xff] %v694_v23  ;;  %v928_v23 = vperm.slane %v901_v22, 0 }
  0xe8   : > { %727 = vst [vmem:[#allocation1 + $0x6] ss:$9 sm:$0xff] %v695_v24  ;;  %v929_v24 = vperm.slane %v901_v22, 1 }
  0xe9   : > { %728 = vst [vmem:[#allocation1 + $0x7] ss:$9 sm:$0xff] %v696_v25  ;;  %v930_v25 = vperm.slane %v901_v22, 2 }
  0xf0   : > { %v729_v30 = vld [vmem:[#allocation1] sm:$0xff] }
  0xf1   : > { %730 = vst [vmem:[#allocation1] ss:$9 sm:$0xff] %v697_v27  ;;  %743 = vperm.xlu1 %1399, %v729_v30   ;;  %v931_v27 = vperm.slane %v901_v22, 3  ;;  %v934_v30 = vperm.slane %v901_v22, 6 }
  0xf2   : > { %731 = vst [vmem:[#allocation1 + $0x1] ss:$9 sm:$0xff] %v698_v28  ;;  %v932_v28 = vperm.slane %v901_v22, 4 }
  0xf3   : > { %732 = vst [vmem:[#allocation1 + $0x2] ss:$9 sm:$0xff] %v699_v29  ;;  %v933_v29 = vperm.slane %v901_v22, 5 }
  0xf4   : > { %733 = vst [vmem:[#allocation1 + $0x3] ss:$9 sm:$0xff] %v700_v31  ;;  %v935_v31 = vperm.slane %v901_v22, 7 }
  0xf5   : > { %734 = vst [vmem:[#allocation1 + $0x4] ss:$9 sm:$0xff] %v701_v32  ;;  %v904_v32 = vpop.xlane.xlu0 %903 }
  0xf6   : > { %735 = vst [vmem:[#allocation1 + $0x5] ss:$9 sm:$0xff] %v702_v33  ;;  %v936_v33 = vperm.slane %v904_v32, 0 }
  0xf7   : > { %736 = vst [vmem:[#allocation1 + $0x6] ss:$9 sm:$0xff] %v703_v34  ;;  %v937_v34 = vperm.slane %v904_v32, 1 }
  0xf8   : > { %737 = vst [vmem:[#allocation1 + $0x7] ss:$9 sm:$0xff] %v704_v35  ;;  %v938_v35 = vperm.slane %v904_v32, 2 }
  0xff   : > { %v738_v40 = vld [vmem:[#allocation1] sm:$0xff] }
 0x100   : > { %816 = vst [vmem:[#allocation1] ss:$9 sm:$0xff] %v784_v37  ;;  %746 = vperm.xlu2 %1400, %v738_v40   ;;  %v939_v37 = vperm.slane %v904_v32, 3  ;;  %v942_v40 = vperm.slane %v904_v32, 6 }
 0x101   : > { %818 = vst [vmem:[#allocation1 + $0x1] ss:$9 sm:$0xff] %v785_v38  ;;  %v940_v38 = vperm.slane %v904_v32, 4 }
 0x102   : > { %820 = vst [vmem:[#allocation1 + $0x2] ss:$9 sm:$0xff] %v786_v39  ;;  %v941_v39 = vperm.slane %v904_v32, 5 }
 0x103   : > { %822 = vst [vmem:[#allocation1 + $0x3] ss:$9 sm:$0xff] %v787_v41  ;;  %v943_v41 = vperm.slane %v904_v32, 7 }
 0x104   : > { %824 = vst [vmem:[#allocation1 + $0x4] ss:$9 sm:$0xff] %v788_v42  ;;  %v907_v42 = vpop.xlane.xlu1 %906 }
 0x105   : > { %826 = vst [vmem:[#allocation1 + $0x5] ss:$9 sm:$0xff] %v789_v43  ;;  %v944_v43 = vperm.slane %v907_v42, 0  ;;  %v947_v46 = vperm.slane %v907_v42, 3 }
 0x106   : > { %828 = vst [vmem:[#allocation1 + $0x6] ss:$9 sm:$0xff] %v790_v44  ;;  %v945_v44 = vperm.slane %v907_v42, 1 }
 0x107   : > { %830 = vst [vmem:[#allocation1 + $0x7] ss:$9 sm:$0xff] %v791_v45  ;;  %v946_v45 = vperm.slane %v907_v42, 2 }
 0x10e   : > { %v831_v50 = vld [vmem:[#allocation1] sm:$0xff] }
 0x10f   : > { %832 = vst [vmem:[#allocation1] ss:$9 sm:$0xff] %v792_v47  ;;  %860 = vperm.xlu1 %1399, %v831_v50   ;;  %v950_v50 = vperm.slane %v907_v42, 6 }
 0x110   : > { %833 = vst [vmem:[#allocation1 + $0x1] ss:$9 sm:$0xff] %v793_v48  ;;  %v948_v48 = vperm.slane %v907_v42, 4 }
 0x111   : > { %834 = vst [vmem:[#allocation1 + $0x2] ss:$9 sm:$0xff] %v794_v49  ;;  %v949_v49 = vperm.slane %v907_v42, 5 }
 0x112   : > { %835 = vst [vmem:[#allocation1 + $0x3] ss:$9 sm:$0xff] %v795_v51  ;;  %v951_v51 = vperm.slane %v907_v42, 7 }
 0x113   : > { %836 = vst [vmem:[#allocation1 + $0x4] ss:$9 sm:$0xff] %v796_v52  ;;  %v1557_v52 = vmov 0.0  }
 0x114   : > { %837 = vst [vmem:[#allocation1 + $0x5] ss:$9 sm:$0xff] %v797_v53  ;;  %v584_v53 = vlaneseq }
 0x115   : > { %838 = vst [vmem:[#allocation1 + $0x6] ss:$9 sm:$0xff] %v798_v54  ;;  %v910_v54 = vpop.xlane.xlu2 %909 }
 0x116   : > { %839 = vst [vmem:[#allocation1 + $0x7] ss:$9 sm:$0xff] %v799_v55  ;;  %v952_v55 = vperm.slane %v910_v54, 0  ;;  %v953_v56 = vperm.slane %v910_v54, 1 }
 0x117   : > { %545 = vst [vmem:[#allocation2] sm:$0x1] %v1557_v52 }
 0x11d   : > { %v840_v60 = vld [vmem:[#allocation1] sm:$0xff] }
 0x11e   : > { %841 = vst [vmem:[#allocation1] ss:$9 sm:$0xff] %v800_v57  ;;  %863 = vperm.xlu2 %1400, %v840_v60   ;;  %v955_v60 = vperm.slane %v910_v54, 3  ;;  %v549_v2 = vld [vmem:[#allocation2] sm:$0x1] }
 0x11f   : > { %842 = vst [vmem:[#allocation1 + $0x1] ss:$9 sm:$0xff] %v801_v58  ;;  %v954_v58 = vperm.slane %v910_v54, 2 }
 0x120   : > { %843 = vst [vmem:[#allocation1 + $0x2] ss:$9 sm:$0xff] %v802_v59  ;;  %v1729_v59 = vand.u32 127, %v584_v53 }
 0x121   : > { %844 = vst [vmem:[#allocation1 + $0x3] ss:$9 sm:$0xff] %v803_v61 }
 0x122   : > { %845 = vst [vmem:[#allocation1 + $0x4] ss:$9 sm:$0xff] %v804_v62  ;;  %v956_v62 = vperm.slane %v910_v54, 4  ;;  %v750_v22 = vadd.s32 4294967264, %v1729_v59 }
 0x123   : > { %846 = vst [vmem:[#allocation1 + $0x5] ss:$9 sm:$0xff] %v805_v63 }
 0x124   : > { %847 = vst [vmem:[#allocation1 + $0x6] ss:$9 sm:$0xff] %v806_v0  ;;  %v957_v0 = vperm.slane %v910_v54, 5 }
 0x125   : > { %848 = vst [vmem:[#allocation1 + $0x7] ss:$9 sm:$0xff] %v807_v1  ;;  %v913_v1 = vpop.xlane.xlu0 %912 }
 0x127   : > { %v583_v57 = vpop.permute.xlu1 %582 }
 0x128   : > { %v586_v63 = vperm.slane %v583_v57, %v1729_v59  ;;  %v1092_v57 = vld [vmem:[%s1841_s1 + $0x68] sm:$0xff] }
 0x12c   : > { %v849_v6 = vld [vmem:[#allocation1] sm:$0xff] }
 0x12d   : > { %850 = vst [vmem:[#allocation1] ss:$9 sm:$0xff] %v808_v3  ;;  %866 = vperm.xlu1 %1399, %v849_v6   ;;  %v958_v3 = vperm.slane %v910_v54, 6  ;;  %v650_v6 = vpop.permute.xlu2 %649 }
 0x12e   : > { %851 = vst [vmem:[#allocation1 + $0x1] ss:$9 sm:$0xff] %v809_v4  ;;  %v959_v4 = vperm.slane %v910_v54, 7 }
 0x12f   : > { %852 = vst [vmem:[#allocation1 + $0x2] ss:$9 sm:$0xff] %v810_v5  ;;  %v588_v5 = vadd.f32 %v586_v63, %v549_v2  ;;  %v1087_v63 = vld [vmem:[%s1841_s1 + $0x40] sm:$0xff]  ;;  %v1084_v2 = vld [vmem:[%s1841_s1 + $0x28] sm:$0xff] }
 0x130   : > { %853 = vst [vmem:[#allocation1 + $0x3] ss:$9 sm:$0xff] %v811_v7  ;;  %v656_v7 = vadd.s32 4294967280, %v1729_v59 }
 0x131   : > { %854 = vst [vmem:[#allocation1 + $0x4] ss:$9 sm:$0xff] %v812_v8 }
 0x132   : > { %855 = vst [vmem:[#allocation1 + $0x5] ss:$9 sm:$0xff] %v813_v9  ;;  %v654_v9 = vadd.s32 4294967288, %v1729_v59 }
 0x133   : > { %856 = vst [vmem:[#allocation1 + $0x6] ss:$9 sm:$0xff] %v814_v10  ;;  %v960_v10 = vperm.slane %v913_v1, 0 }
 0x134   : > { %857 = vst [vmem:[#allocation1 + $0x7] ss:$9 sm:$0xff] %v815_v11  ;;  %v961_v11 = vperm.slane %v913_v1, 1 }
 0x135   : > { %590 = vst.msk [vmem:[#allocation2] sm:$0x1] %vm589_vm4, %v588_v5  ;;  %v1081_v5 = vld [vmem:[%s1841_s1 + $0x10] sm:$0xff] }
 0x13b   : > { %v858_v16 = vld [vmem:[#allocation1] sm:$0xff] }
 0x13c   : > { %968 = vst [vmem:[#allocation1] ss:$9 sm:$0xff] %v920_v13  ;;  %869 = vperm.xlu0 %1401, %v858_v16   ;;  %v962_v13 = vperm.slane %v913_v1, 2 }
 0x13d   : > { %970 = vst [vmem:[#allocation1 + $0x1] ss:$9 sm:$0xff] %v921_v14  ;;  %v655_v14 = vperm.slane %v650_v6, %v654_v9  ;;  %v1080_v6 = vld [vmem:[%s1841_s1 + $0x8] sm:$0xff] }
 0x13e   : > { %972 = vst [vmem:[#allocation1 + $0x2] ss:$9 sm:$0xff] %v922_v15  ;;  %v963_v15 = vperm.slane %v913_v1, 3 }
 0x13f   : > { %974 = vst [vmem:[#allocation1 + $0x3] ss:$9 sm:$0xff] %v923_v17  ;;  %v964_v17 = vperm.slane %v913_v1, 4 }
 0x140   : > { %976 = vst [vmem:[#allocation1 + $0x4] ss:$9 sm:$0xff] %v924_v18  ;;  %v741_v18 = vpop.permute.xlu2 %740 }
 0x141   : > { %978 = vst [vmem:[#allocation1 + $0x5] ss:$9 sm:$0xff] %v925_v19  ;;  %v965_v19 = vperm.slane %v913_v1, 5 }
 0x142   : > { %980 = vst [vmem:[#allocation1 + $0x6] ss:$9 sm:$0xff] %v926_v20 }
 0x143   : > { %982 = vst [vmem:[#allocation1 + $0x7] ss:$9 sm:$0xff] %v927_v21  ;;  %v966_v21 = vperm.slane %v913_v1, 6 }
 0x145   : > { %v653_v8 = vpop.permute.xlu0 %652 }
 0x146   : > { %v657_v12 = vperm.slane %v653_v8, %v656_v7  ;;  %v1079_v7 = vld [vmem:[%s1841_s1] sm:$0xff] }
 0x148   : > { %v659_v20 = vsel %vm658_vm5, %v657_v12, %v655_v14  ;;  %v1047_v12 = vadd.s32 4294967216, %v1729_v59 }
 0x14a   : > { %v983_v26 = vld [vmem:[#allocation1] sm:$0xff] }
 0x14b   : > { %984 = vst [vmem:[#allocation1] ss:$9 sm:$0xff] %v928_v23  ;;  %1030 = vperm.xlu2 %1400, %v983_v26   ;;  %v967_v23 = vperm.slane %v913_v1, 7  ;;  %v748_v26 = vadd.s32 4294967272, %v1729_v59  ;;  %v1085_v1 = vld [vmem:[%s1841_s1 + $0x30] sm:$0xff] }
 0x14c   : > { %985 = vst [vmem:[#allocation1 + $0x1] ss:$9 sm:$0xff] %v929_v24  ;;  %v595_v24 = vld [vmem:[#allocation2] sm:$0x1] }
 0x14d   : > { %986 = vst [vmem:[#allocation1 + $0x2] ss:$9 sm:$0xff] %v930_v25 }
 0x14e   : > { %987 = vst [vmem:[#allocation1 + $0x3] ss:$9 sm:$0xff] %v931_v27  ;;  %v661_v27 = vadd.f32 %v659_v20, %v595_v24 }
 0x14f   : > { %988 = vst [vmem:[#allocation1 + $0x4] ss:$9 sm:$0xff] %v932_v28 }
 0x150   : > { %989 = vst [vmem:[#allocation1 + $0x5] ss:$9 sm:$0xff] %v933_v29  ;;  %v754_v29 = vadd.s32 4294967256, %v1729_v59 }
 0x151   : > { %990 = vst [vmem:[#allocation1 + $0x6] ss:$9 sm:$0xff] %v934_v30  ;;  %v749_v30 = vperm.slane %v741_v18, %v748_v26  ;;  %v1057_v18 = vadd.s32 4294967192, %v1729_v59 }
 0x152   : > { %991 = vst [vmem:[#allocation1 + $0x7] ss:$9 sm:$0xff] %v935_v31 }
 0x153   : > { %663 = vst.msk [vmem:[#allocation2] sm:$0x1] %vm662_vm6, %v661_v27 }
 0x159   : > { %v992_v36 = vld [vmem:[#allocation1] sm:$0xff] }
 0x15a   : > { %993 = vst [vmem:[#allocation1] ss:$9 sm:$0xff] %v936_v33  ;;  %1033 = vperm.xlu1 %1399, %v992_v36   ;;  %v747_v31 = vpop.permute.xlu2 %746  ;;  %v667_v36 = vld [vmem:[#allocation2] sm:$0x1] }
 0x15b   : > { %994 = vst [vmem:[#allocation1 + $0x1] ss:$9 sm:$0xff] %v937_v34  ;;  %v755_v33 = vperm.slane %v747_v31, %v754_v29 }
 0x15c   : > { %995 = vst [vmem:[#allocation1 + $0x2] ss:$9 sm:$0xff] %v938_v35 }
 0x15d   : > { %996 = vst [vmem:[#allocation1 + $0x3] ss:$9 sm:$0xff] %v939_v37 }
 0x15e   : > { %997 = vst [vmem:[#allocation1 + $0x4] ss:$9 sm:$0xff] %v940_v38 }
 0x15f   : > { %998 = vst [vmem:[#allocation1 + $0x5] ss:$9 sm:$0xff] %v941_v39  ;;  %v871_v39 = vadd.s32 4294967248, %v1729_v59 }
 0x160   : > { %999 = vst [vmem:[#allocation1 + $0x6] ss:$9 sm:$0xff] %v942_v40  ;;  %v877_v40 = vadd.s32 4294967232, %v1729_v59 }
 0x161   : > { %1000 = vst [vmem:[#allocation1 + $0x7] ss:$9 sm:$0xff] %v943_v41  ;;  %v873_v41 = vadd.s32 4294967240, %v1729_v59 }
 0x163   : > { %v744_v25 = vpop.permute.xlu1 %743 }
 0x164   : > { %v751_v28 = vperm.slane %v744_v25, %v750_v22  ;;  %v1065_v22 = vadd.s32 4294967176, %v1729_v59 }
 0x166   : > { %v753_v32 = vsel %vm752_vm7, %v751_v28, %v749_v30 }
 0x167   : > { %v757_v34 = vsel %vm756_vm8, %v755_v33, %v753_v32 }
 0x168   : > { %v1001_v47 = vld [vmem:[#allocation1] sm:$0xff]  ;;  %v759_v37 = vadd.f32 %v757_v34, %v667_v36 }
 0x169   : > { %1036 = vperm.xlu0 %1401, %v1001_v47   ;;  %1002 = vst [vmem:[#allocation1] ss:$9 sm:$0xff] %v944_v43 }
 0x16a   : > { %1003 = vst [vmem:[#allocation1 + $0x1] ss:$9 sm:$0xff] %v945_v44 }
 0x16b   : > { %1004 = vst [vmem:[#allocation1 + $0x2] ss:$9 sm:$0xff] %v946_v45  ;;  %v881_v45 = vadd.s32 4294967224, %v1729_v59 }
 0x16c   : > { %1005 = vst [vmem:[#allocation1 + $0x3] ss:$9 sm:$0xff] %v947_v46 }
 0x16d   : > { %1006 = vst [vmem:[#allocation1 + $0x4] ss:$9 sm:$0xff] %v948_v48 }
 0x16e   : > { %1007 = vst [vmem:[#allocation1 + $0x5] ss:$9 sm:$0xff] %v949_v49 }
 0x16f   : > { %1008 = vst [vmem:[#allocation1 + $0x6] ss:$9 sm:$0xff] %v950_v50 }
 0x170   : > { %1009 = vst [vmem:[#allocation1 + $0x7] ss:$9 sm:$0xff] %v951_v51 }
 0x171   : > { %761 = vst.msk [vmem:[#allocation2] sm:$0x1] %vm760_vm9, %v759_v37 }
 0x177   : > { %v1010_v61 = vld [vmem:[#allocation1] sm:$0xff] }
 0x178   : > { %1039 = vperm.xlu2 %1400, %v1010_v61   ;;  %1011 = vst [vmem:[#allocation1] ss:$9 sm:$0xff] %v952_v55  ;;  %v864_v43 = vpop.permute.xlu2 %863  ;;  %v766_v52 = vld [vmem:[#allocation2] sm:$0x1]  ;;  %v1094_v55 = vld [vmem:[%s1841_s1 + $0x78] sm:$0xff]  ;;  %v1089_v61 = vld [vmem:[%s1841_s1 + $0x50] sm:$0xff] }
 0x179   : > { %1012 = vst [vmem:[#allocation1 + $0x1] ss:$9 sm:$0xff] %v953_v56  ;;  %v874_v47 = vperm.slane %v864_v43, %v873_v41  ;;  %v1093_v56 = vld [vmem:[%s1841_s1 + $0x70] sm:$0xff]  ;;  %1096 = vmatpush.msra.mxu0 %v1094_v55 }
 0x17a   : > { %1013 = vst [vmem:[#allocation1 + $0x2] ss:$9 sm:$0xff] %v954_v58  ;;  %v1091_v58 = vld [vmem:[%s1841_s1 + $0x60] sm:$0xff] }
 0x17b   : > { %1014 = vst [vmem:[#allocation1 + $0x3] ss:$9 sm:$0xff] %v955_v60  ;;  %1097 = vmatpush.msra.mxu0 %v1093_v56  ;;  %v1090_v60 = vld [vmem:[%s1841_s1 + $0x58] sm:$0xff] }
 0x17c   : > { %1015 = vst [vmem:[#allocation1 + $0x4] ss:$9 sm:$0xff] %v956_v62  ;;  %v1088_v62 = vld [vmem:[%s1841_s1 + $0x48] sm:$0xff] }
 0x17d   : > { %1016 = vst [vmem:[#allocation1 + $0x5] ss:$9 sm:$0xff] %v957_v0  ;;  %1098 = vmatpush.msra.mxu0 %v1092_v57  ;;  %v1086_v0 = vld [vmem:[%s1841_s1 + $0x38] sm:$0xff] }
 0x17e   : > { %1017 = vst [vmem:[#allocation1 + $0x6] ss:$9 sm:$0xff] %v958_v3  ;;  %v1083_v3 = vld [vmem:[%s1841_s1 + $0x20] sm:$0xff] }
 0x17f   : > { %1018 = vst [vmem:[#allocation1 + $0x7] ss:$9 sm:$0xff] %v959_v4  ;;  %1099 = vmatpush.msra.mxu0 %v1091_v58  ;;  %v1082_v4 = vld [vmem:[%s1841_s1 + $0x18] sm:$0xff] }
 0x181   : > { %v861_v38 = vpop.permute.xlu1 %860  ;;  %1100 = vmatpush.msra.mxu0 %v1090_v60 }
 0x182   : > { %v872_v44 = vperm.slane %v861_v38, %v871_v39 }
 0x183   : > { %1101 = vmatpush.msra.mxu0 %v1089_v61 }
 0x184   : > { %v876_v49 = vsel %vm875_vm10, %v874_v47, %v872_v44 }
 0x185   : > { %1102 = vmatpush.msra.mxu0 %v1088_v62 }
 0x186   : > { %v1019_v16 = vld [vmem:[#allocation1] sm:$0xff] }
 0x187   : > { %1042 = vperm.xlu1 %1399, %v1019_v16   ;;  %1020 = vst [vmem:[#allocation1] ss:$9 sm:$0xff] %v960_v10  ;;  %1103 = vmatpush.msra.mxu0 %v1087_v63  ;;  %v1049_v10 = vadd.s32 4294967208, %v1729_v59  ;;  %v1061_v16 = vadd.s32 4294967184, %v1729_v59 }
 0x188   : > { %1021 = vst [vmem:[#allocation1 + $0x1] ss:$9 sm:$0xff] %v961_v11  ;;  %v1053_v11 = vadd.s32 4294967200, %v1729_v59  ;;  %v1077_v59 = vld [vmem:[%s1840_s0] sm:$0x1] }
 0x189   : > { %1022 = vst [vmem:[#allocation1 + $0x2] ss:$9 sm:$0xff] %v962_v13  ;;  %1104 = vmatpush.msra.mxu0 %v1086_v0 }
 0x18a   : > { %1023 = vst [vmem:[#allocation1 + $0x3] ss:$9 sm:$0xff] %v963_v15 }
 0x18b   : > { %1024 = vst [vmem:[#allocation1 + $0x4] ss:$9 sm:$0xff] %v964_v17  ;;  %1105 = vmatpush.msra.mxu0 %v1085_v1 }
 0x18c   : > { %1025 = vst [vmem:[#allocation1 + $0x5] ss:$9 sm:$0xff] %v965_v19 }
 0x18d   : > { %1026 = vst [vmem:[#allocation1 + $0x6] ss:$9 sm:$0xff] %v966_v21  ;;  %1106 = vmatpush.msra.mxu0 %v1084_v2 }
 0x18e   : > { %1027 = vst [vmem:[#allocation1 + $0x7] ss:$9 sm:$0xff] %v967_v23 }
 0x18f   : > { %1107 = vmatpush.msra.mxu0 %v1083_v3 }
 0x191   : > { %1108 = vmatpush.msra.mxu0 %v1082_v4 }
 0x193   : > { %1109 = vmatpush.msra.mxu0 %v1081_v5 }
 0x195   : > { %v1028_v35 = vld [vmem:[#allocation1] sm:$0xff]  ;;  %1110 = vmatpush.msra.mxu0 %v1080_v6 }
 0x196   : > { %1045 = vperm.xlu0 %1401, %v1028_v35   ;;  %v1095_v35 = vld [vmem:[%s1842_s2] sm:$0x1] }
 0x197   : > { %1111 = vmatpush.msra.mxu0 %v1079_v7 }
 0x19f   : > { %v867_v42 = vpop.permute.xlu1 %866 }
 0x1a0   : > { %v878_v46 = vperm.slane %v867_v42, %v877_v40 }
 0x1a2   : > { %v880_v51 = vsel %vm879_vm11, %v878_v46, %v876_v49 }
 0x1a5   : > { %v1031_v9 = vpop.permute.xlu2 %1030 }
 0x1a6   : > { %v1048_v17 = vperm.slane %v1031_v9, %v1047_v12 }
 0x1ae   : > { %v870_v48 = vpop.permute.xlu0 %869 }
 0x1af   : > { %v882_v50 = vperm.slane %v870_v48, %v881_v45 }
 0x1b1   : > { %v884_v53 = vsel %vm883_vm12, %v882_v50, %v880_v51 }
 0x1b2   : > { %v886_v54 = vadd.f32 %v884_v53, %v766_v52 }
 0x1b4   : > { %888 = vst.msk [vmem:[#allocation2] sm:$0x1] %vm887_vm13, %v886_v54 }
 0x1bb   : > { %v895_v30 = vld [vmem:[#allocation2] sm:$0x1] }
 0x1cc   : > { %v1034_v8 = vpop.permute.xlu1 %1033 }
 0x1cd   : > { %v1050_v14 = vperm.slane %v1034_v8, %v1049_v10 }
 0x1cf   : > { %v1052_v21 = vsel %vm1051_vm14, %v1050_v14, %v1048_v17 }
 0x1d2   : > { %v1040_v20 = vpop.permute.xlu2 %1039 }
 0x1d3   : > { %v1058_v25 = vperm.slane %v1040_v20, %v1057_v18 }
 0x1db   : > { %v1037_v13 = vpop.permute.xlu0 %1036 }
 0x1dc   : > { %v1054_v15 = vperm.slane %v1037_v13, %v1053_v11 }
 0x1de   : > { %v1056_v23 = vsel %vm1055_vm15, %v1054_v15, %v1052_v21 }
 0x1df   : > { %v1060_v27 = vsel %vm1059_vm0, %v1058_v25, %v1056_v23 }
 0x1f9   : > { %v1043_v19 = vpop.permute.xlu1 %1042 }
 0x1fa   : > { %v1062_v24 = vperm.slane %v1043_v19, %v1061_v16 }
 0x1fc   : > { %v1064_v29 = vsel %vm1063_vm1, %v1062_v24, %v1060_v27 }
 0x208   : > { %v1046_v26 = vpop.permute.xlu0 %1045 }
 0x209   : > { %v1066_v28 = vperm.slane %v1046_v26, %v1065_v22 }
 0x20b   : > { %v1068_v31 = vsel %vm1067_vm2, %v1066_v28, %v1064_v29 }
 0x20c   : > { %v1070_v32 = vadd.f32 %v1068_v31, %v895_v30 }
 0x20e   : > { %1072 = vst.msk [vmem:[#allocation2] sm:$0x1] %vm1071_vm3, %v1070_v32 }
 0x215   : > { %v1076_v33 = vld [vmem:[#allocation2] sm:$0x1] }
 0x216   : > { %v1078_v34 = vmul.f32 %v1077_v59, %v1076_v33 }
 0x218   : > { %1112 = vmatmul.f32.vlgmr.msra.gmra.mxu0 %v1078_v34 }
 0x295   : > { %v1113_v36 = vpop.f32.mrf.mxu0 }
 0x296   : > { %v1114_v37 = vadd.f32 %v1113_v36, %v1095_v35 }
 0x298   : > { %v1317_v38 = vmul.f32 -1.442695, %v1114_v37 }
 0x29a   : > { %1402 = vpow2.f32 %v1317_v38 }
 0x2a0   : > { %v1403_v39 = vpop.eup %1402 }
 0x2a1   : > { %v1119_v40 = vadd.f32 1.0, %v1403_v39 }
 0x2a3   : > { %1404 = vrcp.f32 %v1119_v40  ;;  %v1131_v44 = vand.u32 2147483648, %v1119_v40  ;;  %v1129_v46 = vand.u32 2147483647, %v1119_v40  ;;  %vm1125_vm5 = vweird.f32 %v1119_v40 }
 0x2a5   : > { %v1132_v48 = vor.u32 1.1754944e-38, %v1131_v44  ;;  %vm1130_vm7 = vcmp.eq.f32.partialorder %v1129_v46, 8.507059e+37 }
 0x2a9   : > { %v1405_v41 = vpop.eup %1404 }
 0x2aa   : > { %v1121_v42 = vmul.f32 %v1405_v41, %v1119_v40  ;;  %vm1126_vm4 = vweird.f32 %v1405_v41 }
 0x2ab   : > { %vm1127_vm6 = vmor %vm1125_vm5, %vm1126_vm4 }
 0x2ac   : > { %v1122_v43 = vsub.f32 1.0, %v1121_v42 }
 0x2ae   : > { %v1123_v45 = vmul.f32 %v1405_v41, %v1122_v43 }
 0x2b0   : > { %v1124_v47 = vadd.f32 %v1405_v41, %v1123_v45 }
 0x2b2   : > { %v1128_v49 = vsel %vm1127_vm6, %v1405_v41, %v1124_v47 }
 0x2b3   : > { %v1133_v50 = vsel %vm1130_vm7, %v1132_v48, %v1128_v49 }
 0x2b4   : > { %1135 = vst [vmem:[%s497_s27] sm:$0x1] %v1133_v50 }
 0x2b5   : > { %1493 = shalt.err (!%p1490_p0)
}
 0x2b6   : > { %1332 = dma.vmem_to_hbm [thread:$0]  (%p1654_p9), %s1148_s29, 16, %s1150_s23, %s1137_s30  }
 0x2b7 PF: > { %s1865_s13 = sld [smem:[#allocation12_spill]]  ;;  %p1342_p1 = pnand %p1308_p12, %p1661_p11 }
 0x2b9   : > { %p1343_p2 = pneg %p1342_p1 }
 0x2bd   : > { %s1161_s11 = sand.u32 1, %s1865_s13  }
 0x2be   : > { %s1162_s9 = scalar_lea.sflag [#allocation5], %s1161_s11 }
 0x2bf   : > { %1527 = dma.done.wait (%p1343_p2), %s1162_s9, 16  }
 0x2c0   : > { %1529 = vsyncadd (%p1343_p2), %s1162_s9, 4294967280  ;;  %s27_s10 = sadd.s32 1, %s1552_s10   ;;  %s1867_s19 = sld [smem:[#allocation13_spill]] }
 0x2c1   : > { %p24_p3 = scmp.ge.s32.totalorder %s27_s10, 4   ;;  %s1868_s29 = sld [smem:[#allocation16_spill]] }
 0x2c2   : > { %s1869_s30 = sld [smem:[#allocation14_spill]]  ;;  %s1871_s27 = smov %s1536_s28 }
 0x2c3   : > { %s1870_s9 = sld [smem:[#allocation15_spill]]  ;;  %26 = sbr.rel (!%p24_p3) target bundleno = 8 (0x8), region = 162 }
 0x2c6   : > { %s1872_s28 = smov %s1867_s19 }
 0x2c8   :  { %1167 = vsyncpa [#allocation4], 1 }
 0x2c9   :  { %1169 = vsyncpa [#allocation4 + $0x1], 1 }
 0x2ca   :  { %1170 = vsyncpa [#allocation7], 1 }
 0x2cb   :  { %1172 = vsyncpa [#allocation7 + $0x1], 1 }
 0x2cc   :  { %1173 = vsyncpa [#allocation5], 1 }
 0x2cd   :  { %1175 = vsyncpa [#allocation5 + $0x1], 1 }

</bundles_post_ra>
